<compile_context>
chip_gen: v7x
topology: tpu7x:2x2x1
jax: 0.10.0
libtpu: 0.0.40
codegen_flags: <defaults>
</compile_context>

<pallas_src>
import math

import jax
import jax.numpy as jnp
from jax.experimental import pallas as pl
from jax.experimental.pallas import tpu as pltpu


def _round_up(x, m):
    return ((x + m - 1) // m) * m


def _cdiv(a, b):
    return (a + b - 1) // b


def _merge_layer_kernel(x1_ref, x2_ref, w1a_ref, w1b_ref, b1_ref, w2_ref, b2_ref,
                        out_ref, acc_ref):
    # One (batch-tile i, hidden-tile k) grid step.
    #   x1_ref: (TB, D1)  x2_ref: (TB, D2)        compute dtype (bf16 or f32)
    #   w1a_ref: (D1, TK) w1b_ref: (D2, TK)       compute dtype
    #   b1_ref: (1, TK) f32   w2_ref: (TK, D4)    compute dtype
    #   b2_ref: (1, D4) f32
    #   out_ref: (TB, D4)     acc_ref: (TB, D4) f32 scratch (accumulates over k)
    k = pl.program_id(1)

    @pl.when(k == 0)
    def _():
        acc_ref[...] = jnp.zeros_like(acc_ref)

    h = jnp.dot(x1_ref[...], w1a_ref[...], preferred_element_type=jnp.float32)
    h = h + jnp.dot(x2_ref[...], w1b_ref[...], preferred_element_type=jnp.float32)
    h = jnp.maximum(h + b1_ref[...], 0.0)                       # ReLU in f32
    acc_ref[...] += jnp.dot(h.astype(w2_ref.dtype), w2_ref[...],
                            preferred_element_type=jnp.float32)

    @pl.when(k == pl.num_programs(1) - 1)
    def _():
        out_ref[...] = (acc_ref[...] + b2_ref[...]).astype(out_ref.dtype)


def merge_layer_forward(x1, x2, w1, b1, w2, b2, *, block_b=512,
                        compute_dtype=jnp.bfloat16, _force_hidden_tiles=None):
    """Forward pass of MergeLayer: fc2(relu(fc1(concat(x1, x2)))).

    x1: (B, dim1), x2: (B, dim2)
    w1: (dim1+dim2, dim3)  b1: (dim3,)   (fc1, stored transposed as (in, out))
    w2: (dim3, dim4)       b2: (dim4,)   (fc2, stored transposed as (in, out))

    compute_dtype: matmul operand dtype (bf16 default = native MXU format on
    v5e/v6e/v7x); accumulation/bias/ReLU are always f32. Returns (B, dim4) in
    x1.dtype.
    """
    B, dim1 = x1.shape
    Bx2, dim2 = x2.shape
    assert B == Bx2, "x1/x2 batch mismatch"
    din, dim3 = w1.shape
    assert din == dim1 + dim2, "w1 must have dim1+dim2 input features"
    dim4 = w2.shape[1]
    out_dtype = x1.dtype

    cdtype = jnp.dtype(compute_dtype)
    in_item = cdtype.itemsize
    out_item = jnp.dtype(out_dtype).itemsize

    # ---- lane-dense padded sizes (multiples of 128) --------------------------------
    D1 = _round_up(dim1, 128)
    D2 = _round_up(dim2, 128)
    D3_base = _round_up(dim3, 128)
    D4 = _round_up(dim4, 128)

    # ---- per-generation VMEM budget (headroom for compiler scratch / temporaries) ---
    try:
        vmem_cap = int(pltpu.get_tpu_info().vmem_capacity_bytes)
    except Exception:
        vmem_cap = 64 << 20          # safe lower bound (v7x per-TensorCore VMEM)
    budget = max(vmem_cap - (12 << 20), 24 << 20)

    # ---- balanced batch tiling + megacore friendliness ------------------------------
    sub = 8 if in_item >= 4 else 16                  # sublane pack for compute dtype
    n_tiles = max(1, _cdiv(B, block_b))
    if n_tiles == 1 and B >= 256:
        n_tiles = 2                                  # keep both v7x TensorCores busy
    tb = _cdiv(B, n_tiles)
    tb = _round_up(tb, 128) if tb >= 128 else _round_up(tb, sub)

    def vmem_need(tb_, tk_):
        # Weights counted double-buffered (conservative even when Buffered(1) applies).
        w = 2 * ((D1 + D2) * tk_ + tk_ * D4) * in_item
        bias = 2 * (tk_ + D4) * 4
        act = 2 * tb_ * (D1 + D2) * in_item          # x1/x2 tiles, double-buffered
        outb = 2 * tb_ * D4 * out_item               # output tile, double-buffered
        acc = tb_ * D4 * 4                           # f32 accumulator scratch
        tmp = tb_ * tk_ * (4 + in_item)              # f32 hidden tile + cast copy
        return w + bias + act + outb + acc + tmp

    # Shrink the batch tile first while keeping the weights fully resident.
    tb_min = max(sub, min(tb, 256))
    while vmem_need(tb, D3_base) > budget and tb > tb_min:
        tb = max(tb_min, _round_up(tb // 2, sub))

    # Stream the hidden dim over an inner grid axis if the weights still do not fit.
    nk, tk = 1, D3_base
    if _force_hidden_tiles is not None:
        tk = _round_up(_cdiv(D3_base, max(1, int(_force_hidden_tiles))), 128)
        nk = _cdiv(D3_base, tk)
    else:
        while tk > 128 and vmem_need(tb, tk) > budget:
            nk += 1
            tk = _round_up(_cdiv(D3_base, nk), 128)
            nk = _cdiv(D3_base, tk)
    # TODO(synk): for extremely large dim1+dim2 the x-tile itself may exceed VMEM;
    # an additional input-feature grid axis would be needed in that regime.
    D3 = nk * tk
    b_pad = _round_up(B, tb)

    # ---- fuse the concat: split w1 into the x1-part and x2-part (static, free) ------
    w1a = w1[:dim1]
    w1b = w1[dim1:]

    # ---- zero padding (exact: zero inputs/weights contribute 0; ReLU(0)=0) ----------
    if D1 != dim1:
        x1 = jnp.pad(x1, ((0, 0), (0, D1 - dim1)))
        w1a = jnp.pad(w1a, ((0, D1 - dim1), (0, 0)))
    if D2 != dim2:
        x2 = jnp.pad(x2, ((0, 0), (0, D2 - dim2)))
        w1b = jnp.pad(w1b, ((0, D2 - dim2), (0, 0)))
    if D3 != dim3:
        w1a = jnp.pad(w1a, ((0, 0), (0, D3 - dim3)))
        w1b = jnp.pad(w1b, ((0, 0), (0, D3 - dim3)))
        b1 = jnp.pad(b1, (0, D3 - dim3))
        w2 = jnp.pad(w2, ((0, D3 - dim3), (0, 0)))
    if D4 != dim4:
        w2 = jnp.pad(w2, ((0, 0), (0, D4 - dim4)))
        b2 = jnp.pad(b2, (0, D4 - dim4))
    if b_pad != B:
        x1 = jnp.pad(x1, ((0, b_pad - B), (0, 0)))
        x2 = jnp.pad(x2, ((0, b_pad - B), (0, 0)))

    # ---- dtype plumbing: bf16/f32 MXU operands, f32 biases --------------------------
    x1c = x1.astype(cdtype)
    x2c = x2.astype(cdtype)
    w1a = w1a.astype(cdtype)
    w1b = w1b.astype(cdtype)
    w2c = w2.astype(cdtype)
    b1_2d = b1.reshape(1, D3).astype(jnp.float32)
    b2_2d = b2.reshape(1, D4).astype(jnp.float32)

    grid = (b_pad // tb, nk)

    def run(single_buffer_weights):
        def wspec(shape, index_map):
            if single_buffer_weights and nk == 1:
                # Constant block index across the whole grid -> one VMEM copy suffices.
                return pl.BlockSpec(shape, index_map, pipeline_mode=pl.Buffered(1))
            return pl.BlockSpec(shape, index_map)

        return pl.pallas_call(
            _merge_layer_kernel,
            out_shape=jax.ShapeDtypeStruct((b_pad, D4), out_dtype),
            grid=grid,
            in_specs=[
                pl.BlockSpec((tb, D1), lambda i, k: (i, 0)),   # streamed per batch tile
                pl.BlockSpec((tb, D2), lambda i, k: (i, 0)),
                wspec((D1, tk), lambda i, k: (0, k)),          # weights: resident / D3-streamed
                wspec((D2, tk), lambda i, k: (0, k)),
                wspec((1, tk), lambda i, k: (0, k)),
                wspec((tk, D4), lambda i, k: (k, 0)),
                wspec((1, D4), lambda i, k: (0, 0)),
            ],
            out_specs=pl.BlockSpec((tb, D4), lambda i, k: (i, 0)),
            scratch_shapes=[pltpu.VMEM((tb, D4), jnp.float32)],
            compiler_params=pltpu.CompilerParams(
                dimension_semantics=("parallel", "arbitrary"),
                vmem_limit_bytes=int(budget),
            ),
        )(x1c, x2c, w1a, w1b, b1_2d, w2c, b2_2d)

    try:
        out_padded = run(True)
    except Exception:
        # Fallback for JAX versions where BlockSpec.pipeline_mode / Buffered(1)
        # is not supported by the Mosaic pallas_call pipeline.
        out_padded = run(False)

    # Strip batch and lane padding (glue; negligible cost).
    return out_padded[:B, :dim4]


def init_merge_layer_params(key, dim1, dim2, dim3, dim4, dtype=jnp.float32):
    """Matches the PyTorch module's parameters.
    fc1.weight (dim3, dim1+dim2) xavier_normal; fc2.weight (dim4, dim3) xavier_normal;
    biases: PyTorch Linear default uniform(-1/sqrt(fan_in), 1/sqrt(fan_in)).
    Weights are stored transposed (in, out) for the kernel."""
    k1, k2, k3, k4 = jax.random.split(key, 4)
    fan_in1, fan_out1 = dim1 + dim2, dim3
    std1 = math.sqrt(2.0 / (fan_in1 + fan_out1))
    w1 = std1 * jax.random.normal(k1, (fan_in1, fan_out1), dtype)   # (in, out)
    bound1 = 1.0 / math.sqrt(fan_in1)
    b1 = jax.random.uniform(k2, (fan_out1,), dtype, -bound1, bound1)

    fan_in2, fan_out2 = dim3, dim4
    std2 = math.sqrt(2.0 / (fan_in2 + fan_out2))
    w2 = std2 * jax.random.normal(k3, (fan_in2, fan_out2), dtype)   # (in, out)
    bound2 = 1.0 / math.sqrt(fan_in2)
    b2 = jax.random.uniform(k4, (fan_out2,), dtype, -bound2, bound2)
    return w1, b1, w2, b2


def _reference(x1, x2, w1, b1, w2, b2):
    x = jnp.concatenate([x1, x2], axis=1)
    h = jnp.maximum(jnp.dot(x, w1, precision=jax.lax.Precision.HIGHEST) + b1, 0.0)
    return jnp.dot(h, w2, precision=jax.lax.Precision.HIGHEST) + b2


if __name__ == "__main__":
    key = jax.random.PRNGKey(0)
    kx1, kx2, kp, ky1, ky2, kp2, kz1, kz2 = jax.random.split(key, 8)

    # Small shapes consistent with the module.
    batch, dim1, dim2, dim3, dim4 = 8, 32, 32, 64, 16
    x1 = jax.random.normal(kx1, (batch, dim1), jnp.float32)
    x2 = jax.random.normal(kx2, (batch, dim2), jnp.float32)
    w1, b1, w2, b2 = init_merge_layer_params(kp, dim1, dim2, dim3, dim4)
    ref = _reference(x1, x2, w1, b1, w2, b2)

    # 1) f32 compute path: tight check of the fused math (concat/pad/ReLU/bias).
    out = jax.block_until_ready(
        merge_layer_forward(x1, x2, w1, b1, w2, b2, compute_dtype=jnp.float32))
    assert out.shape == (batch, dim4)
    assert jnp.allclose(out, ref, atol=1e-3, rtol=1e-3)

    # 2) Default bf16 MXU path (f32 accumulation): looser tolerance vs the f32 ref.
    out_bf = jax.block_until_ready(merge_layer_forward(x1, x2, w1, b1, w2, b2))
    assert out_bf.shape == (batch, dim4)
    assert jnp.allclose(out_bf, ref, atol=1e-1, rtol=1e-1)

    # 3) Gridded / partial-batch-tile path (B not a multiple of the tile), bf16.
    batch2 = 300
    y1 = jax.random.normal(ky1, (batch2, dim1), jnp.float32)
    y2 = jax.random.normal(ky2, (batch2, dim2), jnp.float32)
    ref2 = _reference(y1, y2, w1, b1, w2, b2)
    out2 = jax.block_until_ready(
        merge_layer_forward(y1, y2, w1, b1, w2, b2, block_b=128))
    assert out2.shape == (batch2, dim4)
    assert jnp.allclose(out2, ref2, atol=1e-1, rtol=1e-1)

    # 4) Hidden-dim streaming path (inner "arbitrary" axis + f32 accumulator),
    #    forced so it is exercised at small sizes; f32 compute for a tight check.
    b3, d1s, d2s, d3s, d4s = 64, 40, 24, 200, 48
    z1 = jax.random.normal(kz1, (b3, d1s), jnp.float32)
    z2 = jax.random.normal(kz2, (b3, d2s), jnp.float32)
    w1_s, b1_s, w2_s, b2_s = init_merge_layer_params(kp2, d1s, d2s, d3s, d4s)
    ref3 = _reference(z1, z2, w1_s, b1_s, w2_s, b2_s)
    out3 = jax.block_until_ready(
        merge_layer_forward(z1, z2, w1_s, b1_s, w2_s, b2_s,
                            compute_dtype=jnp.float32, _force_hidden_tiles=2))
    assert out3.shape == (b3, d4s)
    assert jnp.allclose(out3, ref3, atol=1e-3, rtol=1e-3)

    print("KERNEL_OK")
</pallas_src>

<mosaic_0001>
module attributes {stable_mosaic.version = 11 : i64} {
  func.func @_merge_layer_kernel(%arg0: i32, %arg1: i32, %arg2: memref<8x128xf32, #tpu.memory_space<vmem>>, %arg3: memref<8x128xf32, #tpu.memory_space<vmem>>, %arg4: memref<128x128xf32, #tpu.memory_space<vmem>>, %arg5: memref<128x128xf32, #tpu.memory_space<vmem>>, %arg6: memref<1x128xf32, #tpu.memory_space<vmem>>, %arg7: memref<128x128xf32, #tpu.memory_space<vmem>>, %arg8: memref<1x128xf32, #tpu.memory_space<vmem>>, %arg9: memref<8x128xf32, #tpu.memory_space<vmem>>, %arg10: memref<8x128xf32, #tpu.memory_space<vmem>>) attributes {dimension_semantics = [#tpu.dimension_semantics<parallel>, #tpu.dimension_semantics<arbitrary>], iteration_bounds = array<i64: 1, 1>, scalar_prefetch = 0 : i64, scratch_operands = 1 : i64, tpu.core_type = #tpu.core_type<tc>, window_params = [{transform_indices = @transform_0, window_bounds = array<i64: 8, 128>}, {transform_indices = @transform_1, window_bounds = array<i64: 8, 128>}, {pipeline_mode = #tpu.pipeline_mode<synchronous>, transform_indices = @transform_2, window_bounds = array<i64: 128, 128>}, {pipeline_mode = #tpu.pipeline_mode<synchronous>, transform_indices = @transform_3, window_bounds = array<i64: 128, 128>}, {pipeline_mode = #tpu.pipeline_mode<synchronous>, transform_indices = @transform_4, window_bounds = array<i64: 1, 128>}, {pipeline_mode = #tpu.pipeline_mode<synchronous>, transform_indices = @transform_5, window_bounds = array<i64: 128, 128>}, {pipeline_mode = #tpu.pipeline_mode<synchronous>, transform_indices = @transform_6, window_bounds = array<i64: 1, 128>}, {transform_indices = @transform_7, window_bounds = array<i64: 8, 128>}]} {
    %c0_i32 = arith.constant 0 : i32
    %0 = arith.cmpi eq, %arg1, %c0_i32 : i32
    %1 = arith.extui %0 : i1 to i32
    %c0_i32_0 = arith.constant 0 : i32
    %2 = arith.cmpi ne, %1, %c0_i32_0 : i32
    scf.if %2 {
      %cst_21 = arith.constant 0.000000e+00 : f32
      %23 = vector.broadcast %cst_21 : f32 to vector<8x128xf32>
      %c0_22 = arith.constant 0 : index
      %c0_23 = arith.constant 0 : index
      %24 = vector.load %arg10[%c0_22, %c0_23] : memref<8x128xf32, #tpu.memory_space<vmem>>, vector<8x128xf32>
      tpu.vector_store %arg10[%c0_22, %c0_23], %23 {strides = array<i32>} : memref<8x128xf32, #tpu.memory_space<vmem>>, vector<8x128xf32>,
    } else {
    }
    %c0 = arith.constant 0 : index
    %c0_1 = arith.constant 0 : index
    %3 = vector.load %arg2[%c0, %c0_1] : memref<8x128xf32, #tpu.memory_space<vmem>>, vector<8x128xf32>
    %c0_2 = arith.constant 0 : index
    %c0_3 = arith.constant 0 : index
    %4 = vector.load %arg4[%c0_2, %c0_3] : memref<128x128xf32, #tpu.memory_space<vmem>>, vector<128x128xf32>
    %cst = arith.constant dense<0.000000e+00> : vector<8x128xf32>
    %5 = tpu.matmul %3, %4, %cst {dimension_numbers = #tpu.dot_dimension_numbers<[1], [0], [0], [1], [0, 0, 1, 1], [], []>} : vector<8x128xf32>, vector<128x128xf32>, vector<8x128xf32> -> vector<8x128xf32>
    %c0_4 = arith.constant 0 : index
    %c0_5 = arith.constant 0 : index
    %6 = vector.load %arg3[%c0_4, %c0_5] : memref<8x128xf32, #tpu.memory_space<vmem>>, vector<8x128xf32>
    %c0_6 = arith.constant 0 : index
    %c0_7 = arith.constant 0 : index
    %7 = vector.load %arg5[%c0_6, %c0_7] : memref<128x128xf32, #tpu.memory_space<vmem>>, vector<128x128xf32>
    %cst_8 = arith.constant dense<0.000000e+00> : vector<8x128xf32>
    %8 = tpu.matmul %6, %7, %cst_8 {dimension_numbers = #tpu.dot_dimension_numbers<[1], [0], [0], [1], [0, 0, 1, 1], [], []>} : vector<8x128xf32>, vector<128x128xf32>, vector<8x128xf32> -> vector<8x128xf32>
    %9 = arith.addf %5, %8 : vector<8x128xf32>
    %c0_9 = arith.constant 0 : index
    %c0_10 = arith.constant 0 : index
    %10 = vector.load %arg6[%c0_9, %c0_10] : memref<1x128xf32, #tpu.memory_space<vmem>>, vector<1x128xf32>
    %11 = vector.broadcast %10 : vector<1x128xf32> to vector<8x128xf32>
    %12 = arith.addf %9, %11 : vector<8x128xf32>
    %cst_11 = arith.constant 0.000000e+00 : f32
    %13 = vector.broadcast %cst_11 : f32 to vector<8x128xf32>
    %14 = arith.maximumf %12, %13 : vector<8x128xf32>
    %c0_12 = arith.constant 0 : index
    %c0_13 = arith.constant 0 : index
    %15 = vector.load %arg10[%c0_12, %c0_13] : memref<8x128xf32, #tpu.memory_space<vmem>>, vector<8x128xf32>
    %c0_14 = arith.constant 0 : index
    %c0_15 = arith.constant 0 : index
    %16 = vector.load %arg7[%c0_14, %c0_15] : memref<128x128xf32, #tpu.memory_space<vmem>>, vector<128x128xf32>
    %cst_16 = arith.constant dense<0.000000e+00> : vector<8x128xf32>
    %17 = tpu.matmul %14, %16, %cst_16 {dimension_numbers = #tpu.dot_dimension_numbers<[1], [0], [0], [1], [0, 0, 1, 1], [], []>} : vector<8x128xf32>, vector<128x128xf32>, vector<8x128xf32> -> vector<8x128xf32>
    %18 = arith.addf %15, %17 : vector<8x128xf32>
    %c0_17 = arith.constant 0 : index
    %c0_18 = arith.constant 0 : index
    %19 = vector.load %arg10[%c0_17, %c0_18] : memref<8x128xf32, #tpu.memory_space<vmem>>, vector<8x128xf32>
    tpu.vector_store %arg10[%c0_17, %c0_18], %18 {strides = array<i32>} : memref<8x128xf32, #tpu.memory_space<vmem>>, vector<8x128xf32>,
    %c0_i32_19 = arith.constant 0 : i32
    %20 = arith.cmpi eq, %arg1, %c0_i32_19 : i32
    %21 = arith.extui %20 : i1 to i32
    %c0_i32_20 = arith.constant 0 : i32
    %22 = arith.cmpi ne, %21, %c0_i32_20 : i32
    scf.if %22 {
      %c0_21 = arith.constant 0 : index
      %c0_22 = arith.constant 0 : index
      %23 = vector.load %arg10[%c0_21, %c0_22] : memref<8x128xf32, #tpu.memory_space<vmem>>, vector<8x128xf32>
      %c0_23 = arith.constant 0 : index
      %c0_24 = arith.constant 0 : index
      %24 = vector.load %arg8[%c0_23, %c0_24] : memref<1x128xf32, #tpu.memory_space<vmem>>, vector<1x128xf32>
      %25 = vector.broadcast %24 : vector<1x128xf32> to vector<8x128xf32>
      %26 = arith.addf %23, %25 : vector<8x128xf32>
      %c0_25 = arith.constant 0 : index
      %c0_26 = arith.constant 0 : index
      %27 = vector.load %arg9[%c0_25, %c0_26] : memref<8x128xf32, #tpu.memory_space<vmem>>, vector<8x128xf32>
      tpu.vector_store %arg9[%c0_25, %c0_26], %26 {strides = array<i32>} : memref<8x128xf32, #tpu.memory_space<vmem>>, vector<8x128xf32>,
    } else {
    }
    return
  }
  func.func @transform_0(%arg0: i32, %arg1: i32) -> (i32, i32) {
    %c0_i32 = arith.constant 0 : i32
    %c0_i32_0 = arith.constant 0 : i32
    return %arg0, %c0_i32 : i32, i32
  }
  func.func @transform_1(%arg0: i32, %arg1: i32) -> (i32, i32) {
    %c0_i32 = arith.constant 0 : i32
    %c0_i32_0 = arith.constant 0 : i32
    return %arg0, %c0_i32 : i32, i32
  }
  func.func @transform_2(%arg0: i32, %arg1: i32) -> (i32, i32) {
    %c0_i32 = arith.constant 0 : i32
    %c0_i32_0 = arith.constant 0 : i32
    return %c0_i32, %arg1 : i32, i32
  }
  func.func @transform_3(%arg0: i32, %arg1: i32) -> (i32, i32) {
    %c0_i32 = arith.constant 0 : i32
    %c0_i32_0 = arith.constant 0 : i32
    return %c0_i32, %arg1 : i32, i32
  }
  func.func @transform_4(%arg0: i32, %arg1: i32) -> (i32, i32) {
    %c0_i32 = arith.constant 0 : i32
    %c0_i32_0 = arith.constant 0 : i32
    return %c0_i32, %arg1 : i32, i32
  }
  func.func @transform_5(%arg0: i32, %arg1: i32) -> (i32, i32) {
    %c0_i32 = arith.constant 0 : i32
    %c0_i32_0 = arith.constant 0 : i32
    return %arg1, %c0_i32 : i32, i32
  }
  func.func @transform_6(%arg0: i32, %arg1: i32) -> (i32, i32) {
    %c0_i32 = arith.constant 0 : i32
    %c0_i32_0 = arith.constant 0 : i32
    %c0_i32_1 = arith.constant 0 : i32
    return %c0_i32, %c0_i32_0 : i32, i32
  }
  func.func @transform_7(%arg0: i32, %arg1: i32) -> (i32, i32) {
    %c0_i32 = arith.constant 0 : i32
    %c0_i32_0 = arith.constant 0 : i32
    return %arg0, %c0_i32 : i32, i32
  }
}

module attributes {stable_mosaic.version = 11 : i64} {
  func.func @_merge_layer_kernel(%arg0: i32, %arg1: i32, %arg2: memref<8x128xf32, #tpu.memory_space<vmem>>, %arg3: memref<8x128xf32, #tpu.memory_space<vmem>>, %arg4: memref<128x128xf32, #tpu.memory_space<vmem>>, %arg5: memref<128x128xf32, #tpu.memory_space<vmem>>, %arg6: memref<1x128xf32, #tpu.memory_space<vmem>>, %arg7: memref<128x128xf32, #tpu.memory_space<vmem>>, %arg8: memref<1x128xf32, #tpu.memory_space<vmem>>, %arg9: memref<8x128xf32, #tpu.memory_space<vmem>>, %arg10: memref<8x128xf32, #tpu.memory_space<vmem>>) attributes {dimension_semantics = [#tpu.dimension_semantics<parallel>, #tpu.dimension_semantics<arbitrary>], iteration_bounds = array<i64: 1, 1>, scalar_prefetch = 0 : i64, scratch_operands = 1 : i64, tpu.core_type = #tpu.core_type<tc>, window_params = [{transform_indices = @transform_0, window_bounds = array<i64: 8, 128>}, {transform_indices = @transform_1, window_bounds = array<i64: 8, 128>}, {transform_indices = @transform_2, window_bounds = array<i64: 128, 128>}, {transform_indices = @transform_3, window_bounds = array<i64: 128, 128>}, {transform_indices = @transform_4, window_bounds = array<i64: 1, 128>}, {transform_indices = @transform_5, window_bounds = array<i64: 128, 128>}, {pipeline_mode = #tpu.pipeline_mode<synchronous>, transform_indices = @transform_6, window_bounds = array<i64: 1, 128>}, {transform_indices = @transform_7, window_bounds = array<i64: 8, 128>}]} {
    %c0_i32 = arith.constant 0 : i32
    %0 = arith.cmpi eq, %arg1, %c0_i32 : i32
    %1 = arith.extui %0 : i1 to i32
    %c0_i32_0 = arith.constant 0 : i32
    %2 = arith.cmpi ne, %1, %c0_i32_0 : i32
    scf.if %2 {
      %cst_21 = arith.constant 0.000000e+00 : f32
      %23 = vector.broadcast %cst_21 : f32 to vector<8x128xf32>
      %c0_22 = arith.constant 0 : index
      %c0_23 = arith.constant 0 : index
      %24 = vector.load %arg10[%c0_22, %c0_23] : memref<8x128xf32, #tpu.memory_space<vmem>>, vector<8x128xf32>
      tpu.vector_store %arg10[%c0_22, %c0_23], %23 {strides = array<i32>} : memref<8x128xf32, #tpu.memory_space<vmem>>, vector<8x128xf32>,
    } else {
    }
    %c0 = arith.constant 0 : index
    %c0_1 = arith.constant 0 : index
    %3 = vector.load %arg2[%c0, %c0_1] : memref<8x128xf32, #tpu.memory_space<vmem>>, vector<8x128xf32>
    %c0_2 = arith.constant 0 : index
    %c0_3 = arith.constant 0 : index
    %4 = vector.load %arg4[%c0_2, %c0_3] : memref<128x128xf32, #tpu.memory_space<vmem>>, vector<128x128xf32>
    %cst = arith.constant dense<0.000000e+00> : vector<8x128xf32>
    %5 = tpu.matmul %3, %4, %cst {dimension_numbers = #tpu.dot_dimension_numbers<[1], [0], [0], [1], [0, 0, 1, 1], [], []>} : vector<8x128xf32>, vector<128x128xf32>, vector<8x128xf32> -> vector<8x128xf32>
    %c0_4 = arith.constant 0 : index
    %c0_5 = arith.constant 0 : index
    %6 = vector.load %arg3[%c0_4, %c0_5] : memref<8x128xf32, #tpu.memory_space<vmem>>, vector<8x128xf32>
    %c0_6 = arith.constant 0 : index
    %c0_7 = arith.constant 0 : index
    %7 = vector.load %arg5[%c0_6, %c0_7] : memref<128x128xf32, #tpu.memory_space<vmem>>, vector<128x128xf32>
    %cst_8 = arith.constant dense<0.000000e+00> : vector<8x128xf32>
    %8 = tpu.matmul %6, %7, %cst_8 {dimension_numbers = #tpu.dot_dimension_numbers<[1], [0], [0], [1], [0, 0, 1, 1], [], []>} : vector<8x128xf32>, vector<128x128xf32>, vector<8x128xf32> -> vector<8x128xf32>
    %9 = arith.addf %5, %8 : vector<8x128xf32>
    %c0_9 = arith.constant 0 : index
    %c0_10 = arith.constant 0 : index
    %10 = vector.load %arg6[%c0_9, %c0_10] : memref<1x128xf32, #tpu.memory_space<vmem>>, vector<1x128xf32>
    %11 = vector.broadcast %10 : vector<1x128xf32> to vector<8x128xf32>
    %12 = arith.addf %9, %11 : vector<8x128xf32>
    %cst_11 = arith.constant 0.000000e+00 : f32
    %13 = vector.broadcast %cst_11 : f32 to vector<8x128xf32>
    %14 = arith.maximumf %12, %13 : vector<8x128xf32>
    %c0_12 = arith.constant 0 : index
    %c0_13 = arith.constant 0 : index
    %15 = vector.load %arg10[%c0_12, %c0_13] : memref<8x128xf32, #tpu.memory_space<vmem>>, vector<8x128xf32>
    %c0_14 = arith.constant 0 : index
    %c0_15 = arith.constant 0 : index
    %16 = vector.load %arg7[%c0_14, %c0_15] : memref<128x128xf32, #tpu.memory_space<vmem>>, vector<128x128xf32>
    %cst_16 = arith.constant dense<0.000000e+00> : vector<8x128xf32>
    %17 = tpu.matmul %14, %16, %cst_16 {dimension_numbers = #tpu.dot_dimension_numbers<[1], [0], [0], [1], [0, 0, 1, 1], [], []>} : vector<8x128xf32>, vector<128x128xf32>, vector<8x128xf32> -> vector<8x128xf32>
    %18 = arith.addf %15, %17 : vector<8x128xf32>
    %c0_17 = arith.constant 0 : index
    %c0_18 = arith.constant 0 : index
    %19 = vector.load %arg10[%c0_17, %c0_18] : memref<8x128xf32, #tpu.memory_space<vmem>>, vector<8x128xf32>
    tpu.vector_store %arg10[%c0_17, %c0_18], %18 {strides = array<i32>} : memref<8x128xf32, #tpu.memory_space<vmem>>, vector<8x128xf32>,
    %c0_i32_19 = arith.constant 0 : i32
    %20 = arith.cmpi eq, %arg1, %c0_i32_19 : i32
    %21 = arith.extui %20 : i1 to i32
    %c0_i32_20 = arith.constant 0 : i32
    %22 = arith.cmpi ne, %21, %c0_i32_20 : i32
    scf.if %22 {
      %c0_21 = arith.constant 0 : index
      %c0_22 = arith.constant 0 : index
      %23 = vector.load %arg10[%c0_21, %c0_22] : memref<8x128xf32, #tpu.memory_space<vmem>>, vector<8x128xf32>
      %c0_23 = arith.constant 0 : index
      %c0_24 = arith.constant 0 : index
      %24 = vector.load %arg8[%c0_23, %c0_24] : memref<1x128xf32, #tpu.memory_space<vmem>>, vector<1x128xf32>
      %25 = vector.broadcast %24 : vector<1x128xf32> to vector<8x128xf32>
      %26 = arith.addf %23, %25 : vector<8x128xf32>
      %c0_25 = arith.constant 0 : index
      %c0_26 = arith.constant 0 : index
      %27 = vector.load %arg9[%c0_25, %c0_26] : memref<8x128xf32, #tpu.memory_space<vmem>>, vector<8x128xf32>
      tpu.vector_store %arg9[%c0_25, %c0_26], %26 {strides = array<i32>} : memref<8x128xf32, #tpu.memory_space<vmem>>, vector<8x128xf32>,
    } else {
    }
    return
  }
  func.func @transform_0(%arg0: i32, %arg1: i32) -> (i32, i32) {
    %c0_i32 = arith.constant 0 : i32
    %c0_i32_0 = arith.constant 0 : i32
    return %arg0, %c0_i32 : i32, i32
  }
  func.func @transform_1(%arg0: i32, %arg1: i32) -> (i32, i32) {
    %c0_i32 = arith.constant 0 : i32
    %c0_i32_0 = arith.constant 0 : i32
    return %arg0, %c0_i32 : i32, i32
  }
  func.func @transform_2(%arg0: i32, %arg1: i32) -> (i32, i32) {
    %c0_i32 = arith.constant 0 : i32
    %c0_i32_0 = arith.constant 0 : i32
    return %c0_i32, %arg1 : i32, i32
  }
  func.func @transform_3(%arg0: i32, %arg1: i32) -> (i32, i32) {
    %c0_i32 = arith.constant 0 : i32
    %c0_i32_0 = arith.constant 0 : i32
    return %c0_i32, %arg1 : i32, i32
  }
  func.func @transform_4(%arg0: i32, %arg1: i32) -> (i32, i32) {
    %c0_i32 = arith.constant 0 : i32
    %c0_i32_0 = arith.constant 0 : i32
    return %c0_i32, %arg1 : i32, i32
  }
  func.func @transform_5(%arg0: i32, %arg1: i32) -> (i32, i32) {
    %c0_i32 = arith.constant 0 : i32
    %c0_i32_0 = arith.constant 0 : i32
    return %arg1, %c0_i32 : i32, i32
  }
  func.func @transform_6(%arg0: i32, %arg1: i32) -> (i32, i32) {
    %c0_i32 = arith.constant 0 : i32
    %c0_i32_0 = arith.constant 0 : i32
    %c0_i32_1 = arith.constant 0 : i32
    return %c0_i32, %c0_i32_0 : i32, i32
  }
  func.func @transform_7(%arg0: i32, %arg1: i32) -> (i32, i32) {
    %c0_i32 = arith.constant 0 : i32
    %c0_i32_0 = arith.constant 0 : i32
    return %arg0, %c0_i32 : i32, i32
  }
}

</mosaic_0001>

<bundles_post_ra>
// kernel: tpu_custom_call.1
= control target key start
LH: loop header
LB: loop body
LE: loop exit
PB: predicated region body
PF: predicated region fallthrough
CT: control target
= control target key end

     0   :  { %12 = vsyncpa [#allocation4], 0  ;;  %s947_s0 = inlined_call_operand.hbm [shape: f32[8,128], index: 0, kind: input, shape index: {}]   ;;  %s948_s1 = inlined_call_operand.hbm [shape: f32[8,128], index: 1, kind: input, shape index: {}]   ;;  %s949_s2 = inlined_call_operand.hbm [shape: f32[128,128], index: 2, kind: input, shape index: {}]   ;;  %s950_s3 = inlined_call_operand.hbm [shape: f32[128,128], index: 3, kind: input, shape index: {}]   ;;  %s951_s4 = inlined_call_operand.vmem [shape: f32[1,128], index: 4, kind: input, shape index: {}]   ;;  %s952_s5 = inlined_call_operand.hbm [shape: f32[128,128], index: 5, kind: input, shape index: {}]   ;;  %s953_s6 = inlined_call_operand.vmem [shape: f32[1,128], index: 6, kind: input, shape index: {}]   ;;  %s954_s7 = inlined_call_operand.hbm [shape: f32[8,128], index: 7, kind: output, shape index: {}]  }
   0x1   :  { %13 = vsyncpa [#allocation7], 0 }
   0x2   :  { %14 = vsyncpa [#allocation10], 0 }
   0x3   :  { %15 = vsyncpa [#allocation5], 0  ;;  %s779_s24 = smov [#allocation6]   ;;  %s639_s28 = scalar_lea.hbm %s948_s1, 128 }
   0x4   :  { %s32_s25 = sshll.u32 %s779_s24, 4  ;;  %p640_p0 = scmp.ne.s32.totalorder %s948_s1, %s639_s28  ;;  %s33_s25 = int_to_ptr.vmem [resolvable:$true] %s32_s25 }
   0x5   :  { %p643_p1 = scmp.lt.u32.totalorder %s639_s28, %s948_s1 }
   0x7   :  { %p645_p2 = pnand %p643_p1, %p640_p0 }
   0x9   :  { %648 = shalt.err (!%p645_p2)
}
   0xa   :  { %s649_s10 = scalar_lea.vmem %s33_s25, 128  ;;  %p654_p4 = scmp.lt.s32.totalorder %s33_s25, %s33_s25 }
   0xb   :  { %p650_p3 = scmp.ne.s32.totalorder %s33_s25, %s649_s10  ;;  %p655_p5 = scmp.lt.s32.totalorder %s649_s10, %s649_s10 }
   0xd   :  { %p656_p6 = por %p655_p5, %p654_p4 }
   0xf   :  { %p657_p7 = pnand %p656_p6, %p650_p3 }
  0x11   :  { %660 = shalt.err (!%p657_p7)
}
  0x12   :  { %35 = dma.hbm_to_vmem [thread:$0]  %s948_s1, 128, %s33_s25, [#allocation7]  }
  0x13   :  { %s780_s13 = smov [#allocation9]   ;;  %s781_s15 = smov [#allocation3]  }
  0x14   :  { %s53_s14 = sshll.u32 %s780_s13, 4  ;;  %s22_s16 = sshll.u32 %s781_s15, 4  ;;  %s54_s14 = int_to_ptr.vmem [resolvable:$true] %s53_s14  ;;  %s23_s16 = int_to_ptr.vmem [resolvable:$true] %s22_s16 }
  0x15   :  { %s661_s19 = scalar_lea.hbm %s950_s3, 2048 }
  0x16   :  { %p662_p8 = scmp.ne.s32.totalorder %s950_s3, %s661_s19  ;;  %p665_p9 = scmp.lt.u32.totalorder %s661_s19, %s950_s3 }
  0x18   :  { %p667_p10 = pnand %p665_p9, %p662_p8 }
  0x1a   :  { %670 = shalt.err (!%p667_p10)
}
  0x1b   :  { %s671_s1 = scalar_lea.vmem %s54_s14, 2048  ;;  %p676_p12 = scmp.lt.s32.totalorder %s54_s14, %s54_s14 }
  0x1c   :  { %p672_p11 = scmp.ne.s32.totalorder %s54_s14, %s671_s1  ;;  %p677_p13 = scmp.lt.s32.totalorder %s671_s1, %s671_s1 }
  0x1e   :  { %p678_p0 = por %p677_p13, %p676_p12 }
  0x20   :  { %p679_p1 = pnand %p678_p0, %p672_p11 }
  0x22   :  { %682 = shalt.err (!%p679_p1)
}
  0x23   :  { %s782_s24 = smov 128   ;;  %s783_s25 = smov 8  }
  0x24   :  { %59 = dma.hbm_to_vmem [thread:$0]  %s950_s3, 2048, %s54_s14, [#allocation10], %s782_s24, %s782_s24, %s783_s25  }
  0x25   :  { %s683_s30 = scalar_lea.hbm %s947_s0, 128 }
  0x26   :  { %p684_p2 = scmp.ne.s32.totalorder %s947_s0, %s683_s30  ;;  %p687_p3 = scmp.lt.u32.totalorder %s683_s30, %s947_s0 }
  0x28   :  { %p689_p4 = pnand %p687_p3, %p684_p2 }
  0x2a   :  { %692 = shalt.err (!%p689_p4)
}
  0x2b   :  { %s693_s12 = scalar_lea.vmem %s23_s16, 128  ;;  %p698_p6 = scmp.lt.s32.totalorder %s23_s16, %s23_s16 }
  0x2c   :  { %p694_p5 = scmp.ne.s32.totalorder %s23_s16, %s693_s12  ;;  %p699_p7 = scmp.lt.s32.totalorder %s693_s12, %s693_s12 }
  0x2e   :  { %p700_p8 = por %p699_p7, %p698_p6 }
  0x30   :  { %p701_p9 = pnand %p700_p8, %p694_p5 }
  0x32   :  { %704 = shalt.err (!%p701_p9)
}
  0x33   :  { %25 = dma.hbm_to_vmem [thread:$0]  %s947_s0, 128, %s23_s16, [#allocation4]  }
  0x34   :  { %s784_s14 = smov [#allocation8]   ;;  %s785_s17 = smov [#allocation11]  }
  0x35   :  { %s41_s15 = sshll.u32 %s784_s14, 4  ;;  %s67_s18 = sshll.u32 %s785_s17, 4  ;;  %s42_s15 = int_to_ptr.vmem [resolvable:$true] %s41_s15  ;;  %s68_s18 = int_to_ptr.vmem [resolvable:$true] %s67_s18 }
  0x36   :  { %s705_s21 = scalar_lea.hbm %s949_s2, 2048 }
  0x37   :  { %p706_p10 = scmp.ne.s32.totalorder %s949_s2, %s705_s21  ;;  %p709_p11 = scmp.lt.u32.totalorder %s705_s21, %s949_s2 }
  0x39   :  { %p711_p12 = pnand %p709_p11, %p706_p10 }
  0x3b   :  { %714 = shalt.err (!%p711_p12)
}
  0x3c   :  { %s715_s0 = scalar_lea.vmem %s42_s15, 2048  ;;  %p720_p0 = scmp.lt.s32.totalorder %s42_s15, %s42_s15 }
  0x3d   :  { %p716_p13 = scmp.ne.s32.totalorder %s42_s15, %s715_s0  ;;  %p721_p1 = scmp.lt.s32.totalorder %s715_s0, %s715_s0 }
  0x3f   :  { %p722_p2 = por %p721_p1, %p720_p0 }
  0x41   :  { %p723_p3 = pnand %p722_p2, %p716_p13 }
  0x43   :  { %726 = shalt.err (!%p723_p3)
}
  0x44   :  { %47 = dma.hbm_to_vmem [thread:$0]  %s949_s2, 2048, %s42_s15, [#allocation7], %s782_s24, %s782_s24, %s783_s25  }
  0x45   :  { %s727_s30 = scalar_lea.hbm %s952_s5, 2048 }
  0x46   :  { %p728_p4 = scmp.ne.s32.totalorder %s952_s5, %s727_s30  ;;  %p731_p5 = scmp.lt.u32.totalorder %s727_s30, %s952_s5 }
  0x48   :  { %p733_p6 = pnand %p731_p5, %p728_p4 }
  0x4a   :  { %736 = shalt.err (!%p733_p6)
}
  0x4b   :  { %s737_s12 = scalar_lea.vmem %s68_s18, 2048  ;;  %p742_p8 = scmp.lt.s32.totalorder %s68_s18, %s68_s18 }
  0x4c   :  { %p738_p7 = scmp.ne.s32.totalorder %s68_s18, %s737_s12  ;;  %p743_p9 = scmp.lt.s32.totalorder %s737_s12, %s737_s12 }
  0x4e   :  { %p744_p10 = por %p743_p9, %p742_p8 }
  0x50   :  { %p745_p11 = pnand %p744_p10, %p738_p7 }
  0x52   :  { %748 = shalt.err (!%p745_p11)
}
  0x53   :  { %73 = dma.hbm_to_vmem [thread:$0]  %s952_s5, 2048, %s68_s18, [#allocation10], %s782_s24, %s782_s24, %s783_s25  }
  0x54   :  { %771 = dma.done.wait [#allocation4], 128  }
  0x55   :  { %772 = vsyncadd [#allocation4], 4294967168 }
  0x56   :  { %773 = dma.done.wait [#allocation7], 2176  }
  0x57   :  { %774 = vsyncadd [#allocation7], 4294965120 }
  0x58   :  { %775 = dma.done.wait [#allocation10], 4096  }
  0x59   :  { %776 = vsyncadd [#allocation10], 4294963200  ;;  %v786_v0 = vmov 0.0|0.0   ;;  %vm787_vm0 = vmmov 0   ;;  %v788_v1 = vmov 0.0   ;;  %v114_v2 = vld [vmem:[#allocation9] sm:$0xff] }
  0x5a   :  { %556 = vmatprep.subr.bf16.mxu0 %v786_v0  ;;  %580 = vmatprep.subr.bf16.mxu1 %v786_v0  ;;  %v115_v3 = vld [vmem:[#allocation9 + $0x8] sm:$0xff]  ;;  %v97_v4 = vld [vmem:[#allocation8] sm:$0xff]  ;;  %v116_v7 = vld [vmem:[#allocation9 + $0x10] sm:$0xff]  ;;  %s789_s14 = smov [#allocation12]  }
  0x5b   :  { %483 = vmatprep.mubr.msk.f32.mxu0 %vm787_vm0, %v788_v1  ;;  %518 = vmatprep.mubr.msk.f32.mxu1 %vm787_vm0, %v788_v1  ;;  %v557_v5 = vpack.c.bf16 %v115_v3, %v114_v2  ;;  %v98_v6 = vld [vmem:[#allocation8 + $0x8] sm:$0xff]  ;;  %v117_v8 = vld [vmem:[#allocation9 + $0x18] sm:$0xff]  ;;  %v99_v10 = vld [vmem:[#allocation8 + $0x10] sm:$0xff]  ;;  %s387_s15 = sshll.u32 %s789_s14, 4  ;;  %s388_s15 = int_to_ptr.vmem [resolvable:$true] %s387_s15 }
  0x5c   :  { %v581_v9 = vpack.c.bf16 %v98_v6, %v97_v4  ;;  %v100_v11 = vld [vmem:[#allocation8 + $0x18] sm:$0xff]  ;;  %v560_v12 = vpack.c.bf16 %v117_v8, %v116_v7  ;;  %v118_v14 = vld [vmem:[#allocation9 + $0x20] sm:$0xff]  ;;  %v119_v15 = vld [vmem:[#allocation9 + $0x28] sm:$0xff]  ;;  %s749_s17 = scalar_lea.vmem %s388_s15, 128  ;;  %p754_p13 = scmp.lt.s32.totalorder %s388_s15, %s388_s15 }
  0x5d   :  { %558 = vmatpush3.bf16.msra.mxu0 %v557_v5  ;;  %v584_v13 = vpack.c.bf16 %v100_v11, %v99_v10  ;;  %v101_v16 = vld [vmem:[#allocation8 + $0x20] sm:$0xff]  ;;  %v102_v17 = vld [vmem:[#allocation8 + $0x28] sm:$0xff]  ;;  %v563_v18 = vpack.c.bf16 %v119_v15, %v118_v14  ;;  %v120_v20 = vld [vmem:[#allocation9 + $0x30] sm:$0xff]  ;;  %p750_p12 = scmp.ne.s32.totalorder %s388_s15, %s749_s17  ;;  %p755_p0 = scmp.lt.s32.totalorder %s749_s17, %s749_s17 }
  0x5e   :  { %582 = vmatpush3.bf16.msra.mxu1 %v581_v9  ;;  %559 = vmatprep.subr.bf16.mxu0 %v786_v0  ;;  %v587_v19 = vpack.c.bf16 %v102_v17, %v101_v16  ;;  %v121_v21 = vld [vmem:[#allocation9 + $0x38] sm:$0xff]  ;;  %v103_v22 = vld [vmem:[#allocation8 + $0x30] sm:$0xff]  ;;  %v122_v26 = vld [vmem:[#allocation9 + $0x40] sm:$0xff] }
  0x5f   :  { %583 = vmatprep.subr.bf16.mxu1 %v786_v0  ;;  %v104_v23 = vld [vmem:[#allocation8 + $0x38] sm:$0xff]  ;;  %v566_v24 = vpack.c.bf16 %v121_v21, %v120_v20  ;;  %v123_v27 = vld [vmem:[#allocation9 + $0x48] sm:$0xff]  ;;  %v105_v28 = vld [vmem:[#allocation8 + $0x40] sm:$0xff]  ;;  %p756_p1 = por %p755_p0, %p754_p13 }
  0x60   :  { %v590_v25 = vpack.c.bf16 %v104_v23, %v103_v22  ;;  %v106_v29 = vld [vmem:[#allocation8 + $0x48] sm:$0xff]  ;;  %v569_v30 = vpack.c.bf16 %v123_v27, %v122_v26  ;;  %v124_v32 = vld [vmem:[#allocation9 + $0x50] sm:$0xff]  ;;  %v125_v33 = vld [vmem:[#allocation9 + $0x58] sm:$0xff] }
  0x61   :  { %561 = vmatpush3.bf16.msra.mxu0 %v560_v12  ;;  %v593_v31 = vpack.c.bf16 %v106_v29, %v105_v28  ;;  %v107_v34 = vld [vmem:[#allocation8 + $0x50] sm:$0xff]  ;;  %v108_v35 = vld [vmem:[#allocation8 + $0x58] sm:$0xff]  ;;  %v572_v36 = vpack.c.bf16 %v125_v33, %v124_v32  ;;  %v126_v38 = vld [vmem:[#allocation9 + $0x60] sm:$0xff]  ;;  %p757_p2 = pnand %p756_p1, %p750_p12 }
  0x62   :  { %585 = vmatpush3.bf16.msra.mxu1 %v584_v13  ;;  %562 = vmatprep.subr.bf16.mxu0 %v786_v0  ;;  %v596_v37 = vpack.c.bf16 %v108_v35, %v107_v34  ;;  %v127_v39 = vld [vmem:[#allocation9 + $0x68] sm:$0xff]  ;;  %v109_v40 = vld [vmem:[#allocation8 + $0x60] sm:$0xff]  ;;  %v128_v44 = vld [vmem:[#allocation9 + $0x70] sm:$0xff] }
  0x63   :  { %586 = vmatprep.subr.bf16.mxu1 %v786_v0  ;;  %v110_v41 = vld [vmem:[#allocation8 + $0x68] sm:$0xff]  ;;  %v575_v42 = vpack.c.bf16 %v127_v39, %v126_v38  ;;  %v129_v45 = vld [vmem:[#allocation9 + $0x78] sm:$0xff]  ;;  %v111_v46 = vld [vmem:[#allocation8 + $0x70] sm:$0xff] }
  0x64   :  { %v599_v43 = vpack.c.bf16 %v110_v41, %v109_v40  ;;  %v112_v47 = vld [vmem:[#allocation8 + $0x78] sm:$0xff]  ;;  %v578_v48 = vpack.c.bf16 %v129_v45, %v128_v44  ;;  %v280_v50 = vld [vmem:[#allocation11] sm:$0xff]  ;;  %v281_v51 = vld [vmem:[#allocation11 + $0x8] sm:$0xff] }
  0x65   :  { %564 = vmatpush3.bf16.msra.mxu0 %v563_v18  ;;  %v602_v49 = vpack.c.bf16 %v112_v47, %v111_v46  ;;  %v113_v52 = vld [vmem:[#allocation6] sm:$0xff]  ;;  %v605_v53 = vpack.c.bf16 %v281_v51, %v280_v50  ;;  %v96_v54 = vld [vmem:[#allocation3] sm:$0xff]  ;;  %v284_v58 = vld [vmem:[#allocation11 + $0x20] sm:$0xff] }
  0x66   :  { %588 = vmatpush3.bf16.msra.mxu1 %v587_v19  ;;  %565 = vmatprep.subr.bf16.mxu0 %v786_v0  ;;  %v282_v55 = vld [vmem:[#allocation11 + $0x10] sm:$0xff]  ;;  %v283_v56 = vld [vmem:[#allocation11 + $0x18] sm:$0xff]  ;;  %v285_v59 = vld [vmem:[#allocation11 + $0x28] sm:$0xff] }
  0x67   :  { %589 = vmatprep.subr.bf16.mxu1 %v786_v0  ;;  %v608_v57 = vpack.c.bf16 %v283_v56, %v282_v55  ;;  %v611_v60 = vpack.c.bf16 %v285_v59, %v284_v58  ;;  %v286_v61 = vld [vmem:[#allocation11 + $0x30] sm:$0xff]  ;;  %v287_v62 = vld [vmem:[#allocation11 + $0x38] sm:$0xff]  ;;  %v288_v2 = vld [vmem:[#allocation11 + $0x40] sm:$0xff] }
  0x68   :  { %v614_v63 = vpack.c.bf16 %v287_v62, %v286_v61  ;;  %v289_v3 = vld [vmem:[#allocation11 + $0x48] sm:$0xff]  ;;  %v290_v5 = vld [vmem:[#allocation11 + $0x50] sm:$0xff]  ;;  %v291_v6 = vld [vmem:[#allocation11 + $0x58] sm:$0xff] }
  0x69   :  { %567 = vmatpush3.bf16.msra.mxu0 %v566_v24  ;;  %v617_v4 = vpack.c.bf16 %v289_v3, %v288_v2  ;;  %v292_v7 = vld [vmem:[#allocation11 + $0x60] sm:$0xff]  ;;  %v293_v8 = vld [vmem:[#allocation11 + $0x68] sm:$0xff]  ;;  %v294_v10 = vld [vmem:[#allocation11 + $0x70] sm:$0xff] }
  0x6a   :  { %591 = vmatpush3.bf16.msra.mxu1 %v590_v25  ;;  %568 = vmatprep.subr.bf16.mxu0 %v786_v0  ;;  %v623_v9 = vpack.c.bf16 %v293_v8, %v292_v7  ;;  %v295_v11 = vld [vmem:[#allocation11 + $0x78] sm:$0xff]  ;;  %v398_v15 = vld [vmem:[%s951_s4] ss:$0 sm:$0xff] }
  0x6b   :  { %592 = vmatprep.subr.bf16.mxu1 %v786_v0  ;;  %v626_v12 = vpack.c.bf16 %v295_v11, %v294_v10 }
  0x6d   :  { %570 = vmatpush3.bf16.msra.mxu0 %v569_v30 }
  0x6e   :  { %594 = vmatpush3.bf16.msra.mxu1 %v593_v31  ;;  %571 = vmatprep.subr.bf16.mxu0 %v786_v0 }
  0x6f   :  { %595 = vmatprep.subr.bf16.mxu1 %v786_v0 }
  0x71   :  { %573 = vmatpush3.bf16.msra.mxu0 %v572_v36 }
  0x72   :  { %597 = vmatpush3.bf16.msra.mxu1 %v596_v37  ;;  %574 = vmatprep.subr.bf16.mxu0 %v786_v0 }
  0x73   :  { %598 = vmatprep.subr.bf16.mxu1 %v786_v0 }
  0x75   :  { %576 = vmatpush3.bf16.msra.mxu0 %v575_v42 }
  0x76   :  { %600 = vmatpush3.bf16.msra.mxu1 %v599_v43  ;;  %577 = vmatprep.subr.bf16.mxu0 %v786_v0 }
  0x77   :  { %601 = vmatprep.subr.bf16.mxu1 %v786_v0 }
  0x79   :  { %579 = vmatpush3.bf16.msra.mxu0 %v578_v48 }
  0x7a   :  { %603 = vmatpush3.bf16.msra.mxu1 %v602_v49  ;;  %604 = vmatprep.subr.bf16.mxu0 %v786_v0 }
  0x7c   :  { %484 = vmatmul.mubr.f32.vlgmr.msra.gmra.mrb[0].mxu0 %v113_v52 }
  0x7d   :  { %519 = vmatmul.mubr.f32.vlgmr.msra.gmra.mrb[0].mxu1 %v96_v54  ;;  %606 = vmatpush3.bf16.msra.mxu0 %v605_v53 }
  0x7e   :  { %607 = vmatprep.subr.bf16.mxu0 %v786_v0  ;;  %553 = vmatprep.mubr.msk.f32.mxu0 %vm787_vm0, %v788_v1  ;;  %v620_v1 = vpack.c.bf16 %v291_v6, %v290_v5 }
  0x81   :  { %609 = vmatpush3.bf16.msra.mxu0 %v608_v57 }
  0x82   :  { %610 = vmatprep.subr.bf16.mxu0 %v786_v0 }
  0x85   :  { %612 = vmatpush3.bf16.msra.mxu0 %v611_v60 }
  0x86   :  { %613 = vmatprep.subr.bf16.mxu0 %v786_v0 }
  0x89   :  { %615 = vmatpush3.bf16.msra.mxu0 %v614_v63 }
  0x8a   :  { %616 = vmatprep.subr.bf16.mxu0 %v786_v0 }
  0x8d   :  { %618 = vmatpush3.bf16.msra.mxu0 %v617_v4 }
  0x8e   :  { %619 = vmatprep.subr.bf16.mxu0 %v786_v0 }
  0x91   :  { %621 = vmatpush3.bf16.msra.mxu0 %v620_v1 }
  0x92   :  { %622 = vmatprep.subr.bf16.mxu0 %v786_v0 }
  0x95   :  { %624 = vmatpush3.bf16.msra.mxu0 %v623_v9 }
  0x96   :  { %625 = vmatprep.subr.bf16.mxu0 %v786_v0  ;;  %v399_v0 = vld [vmem:[%s953_s6] ss:$0 sm:$0xff] }
  0x99   :  { %627 = vmatpush3.bf16.msra.mxu0 %v626_v12 }
 0x14f   :  { %v196_v13 = vpop.f32.mrb[0].mxu0 }
 0x150   :  { %v266_v14 = vpop.f32.mrb[0].mxu1  ;;  %v485_v16 = vpop.f32.mrb[1].mxu0 }
 0x151   :  { %v267_v17 = vadd.f32 %v266_v14, %v196_v13  ;;  %v520_v18 = vpop.f32.mrb[1].mxu1 }
 0x153   :  { %v277_v19 = vadd.f32 %v398_v15, %v267_v17 }
 0x155   :  { %v278_v20 = vmax.f32 %v277_v19, 0.0 }
 0x157   :  { %554 = vmatmul.mubr.f32.vlgmr.msra.gmra.mrb[2].mxu0 %v278_v20 }
 0x22a   :  { %v362_v21 = vpop.f32.mrb[2].mxu0 }
 0x22b   :  { %v379_v22 = vadd.f32 %v399_v0, %v362_v21  ;;  %v555_v23 = vpop.f32.mrb[3].mxu0 }
 0x22d   :  { %380 = vst [vmem:[#allocation12] sm:$0xff] %v379_v22 }
 0x22e   :  { %760 = shalt.err (!%p757_p2)
}
 0x22f   :  { %s761_s19 = scalar_lea.hbm %s954_s7, 128 }
 0x230   :  { %p762_p3 = scmp.ne.s32.totalorder %s954_s7, %s761_s19  ;;  %p765_p4 = scmp.lt.u32.totalorder %s761_s19, %s954_s7 }
 0x232   :  { %p767_p5 = pnand %p765_p4, %p762_p3 }
 0x234   :  { %770 = shalt.err (!%p767_p5)
}
 0x235   :  { %390 = dma.vmem_to_hbm [thread:$0]  %s388_s15, 128, %s954_s7, [#allocation5]  }
 0x236   :  { %777 = dma.done.wait [#allocation5], 128  }
 0x237   :  { %778 = vsyncadd [#allocation5], 4294967168 }
 0x238   :  { %394 = vsyncpa [#allocation4], 1 }
 0x239   :  { %395 = vsyncpa [#allocation7], 1 }
 0x23a   :  { %396 = vsyncpa [#allocation10], 1 }
 0x23b   :  { %397 = vsyncpa [#allocation5], 1 }

// kernel: tpu_custom_call.1
= control target key start
LH: loop header
LB: loop body
LE: loop exit
PB: predicated region body
PF: predicated region fallthrough
CT: control target
= control target key end

     0   :  { %12 = vsyncpa [#allocation4], 0  ;;  %s947_s0 = inlined_call_operand.hbm [shape: f32[8,128], index: 0, kind: input, shape index: {}]   ;;  %s948_s1 = inlined_call_operand.hbm [shape: f32[8,128], index: 1, kind: input, shape index: {}]   ;;  %s949_s2 = inlined_call_operand.hbm [shape: f32[128,128], index: 2, kind: input, shape index: {}]   ;;  %s950_s3 = inlined_call_operand.hbm [shape: f32[128,128], index: 3, kind: input, shape index: {}]   ;;  %s951_s4 = inlined_call_operand.vmem [shape: f32[1,128], index: 4, kind: input, shape index: {}]   ;;  %s952_s5 = inlined_call_operand.hbm [shape: f32[128,128], index: 5, kind: input, shape index: {}]   ;;  %s953_s6 = inlined_call_operand.vmem [shape: f32[1,128], index: 6, kind: input, shape index: {}]   ;;  %s954_s7 = inlined_call_operand.hbm [shape: f32[8,128], index: 7, kind: output, shape index: {}]  }
   0x1   :  { %13 = vsyncpa [#allocation7], 0 }
   0x2   :  { %14 = vsyncpa [#allocation10], 0 }
   0x3   :  { %15 = vsyncpa [#allocation5], 0  ;;  %s779_s24 = smov [#allocation6]   ;;  %s639_s28 = scalar_lea.hbm %s948_s1, 128 }
   0x4   :  { %s32_s25 = sshll.u32 %s779_s24, 4  ;;  %p640_p0 = scmp.ne.s32.totalorder %s948_s1, %s639_s28  ;;  %s33_s25 = int_to_ptr.vmem [resolvable:$true] %s32_s25 }
   0x5   :  { %p643_p1 = scmp.lt.u32.totalorder %s639_s28, %s948_s1 }
   0x7   :  { %p645_p2 = pnand %p643_p1, %p640_p0 }
   0x9   :  { %648 = shalt.err (!%p645_p2)
}
   0xa   :  { %s649_s10 = scalar_lea.vmem %s33_s25, 128  ;;  %p654_p4 = scmp.lt.s32.totalorder %s33_s25, %s33_s25 }
   0xb   :  { %p650_p3 = scmp.ne.s32.totalorder %s33_s25, %s649_s10  ;;  %p655_p5 = scmp.lt.s32.totalorder %s649_s10, %s649_s10 }
   0xd   :  { %p656_p6 = por %p655_p5, %p654_p4 }
   0xf   :  { %p657_p7 = pnand %p656_p6, %p650_p3 }
  0x11   :  { %660 = shalt.err (!%p657_p7)
}
  0x12   :  { %35 = dma.hbm_to_vmem [thread:$0]  %s948_s1, 128, %s33_s25, [#allocation7]  }
  0x13   :  { %s780_s13 = smov [#allocation9]   ;;  %s781_s15 = smov [#allocation3]  }
  0x14   :  { %s53_s14 = sshll.u32 %s780_s13, 4  ;;  %s22_s16 = sshll.u32 %s781_s15, 4  ;;  %s54_s14 = int_to_ptr.vmem [resolvable:$true] %s53_s14  ;;  %s23_s16 = int_to_ptr.vmem [resolvable:$true] %s22_s16 }
  0x15   :  { %s661_s19 = scalar_lea.hbm %s950_s3, 2048 }
  0x16   :  { %p662_p8 = scmp.ne.s32.totalorder %s950_s3, %s661_s19  ;;  %p665_p9 = scmp.lt.u32.totalorder %s661_s19, %s950_s3 }
  0x18   :  { %p667_p10 = pnand %p665_p9, %p662_p8 }
  0x1a   :  { %670 = shalt.err (!%p667_p10)
}
  0x1b   :  { %s671_s1 = scalar_lea.vmem %s54_s14, 2048  ;;  %p676_p12 = scmp.lt.s32.totalorder %s54_s14, %s54_s14 }
  0x1c   :  { %p672_p11 = scmp.ne.s32.totalorder %s54_s14, %s671_s1  ;;  %p677_p13 = scmp.lt.s32.totalorder %s671_s1, %s671_s1 }
  0x1e   :  { %p678_p0 = por %p677_p13, %p676_p12 }
  0x20   :  { %p679_p1 = pnand %p678_p0, %p672_p11 }
  0x22   :  { %682 = shalt.err (!%p679_p1)
}
  0x23   :  { %s782_s24 = smov 128   ;;  %s783_s25 = smov 8  }
  0x24   :  { %59 = dma.hbm_to_vmem [thread:$0]  %s950_s3, 2048, %s54_s14, [#allocation10], %s782_s24, %s782_s24, %s783_s25  }
  0x25   :  { %s683_s30 = scalar_lea.hbm %s947_s0, 128 }
  0x26   :  { %p684_p2 = scmp.ne.s32.totalorder %s947_s0, %s683_s30  ;;  %p687_p3 = scmp.lt.u32.totalorder %s683_s30, %s947_s0 }
  0x28   :  { %p689_p4 = pnand %p687_p3, %p684_p2 }
  0x2a   :  { %692 = shalt.err (!%p689_p4)
}
  0x2b   :  { %s693_s12 = scalar_lea.vmem %s23_s16, 128  ;;  %p698_p6 = scmp.lt.s32.totalorder %s23_s16, %s23_s16 }
  0x2c   :  { %p694_p5 = scmp.ne.s32.totalorder %s23_s16, %s693_s12  ;;  %p699_p7 = scmp.lt.s32.totalorder %s693_s12, %s693_s12 }
  0x2e   :  { %p700_p8 = por %p699_p7, %p698_p6 }
  0x30   :  { %p701_p9 = pnand %p700_p8, %p694_p5 }
  0x32   :  { %704 = shalt.err (!%p701_p9)
}
  0x33   :  { %25 = dma.hbm_to_vmem [thread:$0]  %s947_s0, 128, %s23_s16, [#allocation4]  }
  0x34   :  { %s784_s14 = smov [#allocation8]   ;;  %s785_s17 = smov [#allocation11]  }
  0x35   :  { %s41_s15 = sshll.u32 %s784_s14, 4  ;;  %s67_s18 = sshll.u32 %s785_s17, 4  ;;  %s42_s15 = int_to_ptr.vmem [resolvable:$true] %s41_s15  ;;  %s68_s18 = int_to_ptr.vmem [resolvable:$true] %s67_s18 }
  0x36   :  { %s705_s21 = scalar_lea.hbm %s949_s2, 2048 }
  0x37   :  { %p706_p10 = scmp.ne.s32.totalorder %s949_s2, %s705_s21  ;;  %p709_p11 = scmp.lt.u32.totalorder %s705_s21, %s949_s2 }
  0x39   :  { %p711_p12 = pnand %p709_p11, %p706_p10 }
  0x3b   :  { %714 = shalt.err (!%p711_p12)
}
  0x3c   :  { %s715_s0 = scalar_lea.vmem %s42_s15, 2048  ;;  %p720_p0 = scmp.lt.s32.totalorder %s42_s15, %s42_s15 }
  0x3d   :  { %p716_p13 = scmp.ne.s32.totalorder %s42_s15, %s715_s0  ;;  %p721_p1 = scmp.lt.s32.totalorder %s715_s0, %s715_s0 }
  0x3f   :  { %p722_p2 = por %p721_p1, %p720_p0 }
  0x41   :  { %p723_p3 = pnand %p722_p2, %p716_p13 }
  0x43   :  { %726 = shalt.err (!%p723_p3)
}
  0x44   :  { %47 = dma.hbm_to_vmem [thread:$0]  %s949_s2, 2048, %s42_s15, [#allocation7], %s782_s24, %s782_s24, %s783_s25  }
  0x45   :  { %s727_s30 = scalar_lea.hbm %s952_s5, 2048 }
  0x46   :  { %p728_p4 = scmp.ne.s32.totalorder %s952_s5, %s727_s30  ;;  %p731_p5 = scmp.lt.u32.totalorder %s727_s30, %s952_s5 }
  0x48   :  { %p733_p6 = pnand %p731_p5, %p728_p4 }
  0x4a   :  { %736 = shalt.err (!%p733_p6)
}
  0x4b   :  { %s737_s12 = scalar_lea.vmem %s68_s18, 2048  ;;  %p742_p8 = scmp.lt.s32.totalorder %s68_s18, %s68_s18 }
  0x4c   :  { %p738_p7 = scmp.ne.s32.totalorder %s68_s18, %s737_s12  ;;  %p743_p9 = scmp.lt.s32.totalorder %s737_s12, %s737_s12 }
  0x4e   :  { %p744_p10 = por %p743_p9, %p742_p8 }
  0x50   :  { %p745_p11 = pnand %p744_p10, %p738_p7 }
  0x52   :  { %748 = shalt.err (!%p745_p11)
}
  0x53   :  { %73 = dma.hbm_to_vmem [thread:$0]  %s952_s5, 2048, %s68_s18, [#allocation10], %s782_s24, %s782_s24, %s783_s25  }
  0x54   :  { %771 = dma.done.wait [#allocation4], 128  }
  0x55   :  { %772 = vsyncadd [#allocation4], 4294967168 }
  0x56   :  { %773 = dma.done.wait [#allocation7], 2176  }
  0x57   :  { %774 = vsyncadd [#allocation7], 4294965120 }
  0x58   :  { %775 = dma.done.wait [#allocation10], 4096  }
  0x59   :  { %776 = vsyncadd [#allocation10], 4294963200  ;;  %v786_v0 = vmov 0.0|0.0   ;;  %vm787_vm0 = vmmov 0   ;;  %v788_v1 = vmov 0.0   ;;  %v114_v2 = vld [vmem:[#allocation9] sm:$0xff] }
  0x5a   :  { %556 = vmatprep.subr.bf16.mxu0 %v786_v0  ;;  %580 = vmatprep.subr.bf16.mxu1 %v786_v0  ;;  %v115_v3 = vld [vmem:[#allocation9 + $0x8] sm:$0xff]  ;;  %v97_v4 = vld [vmem:[#allocation8] sm:$0xff]  ;;  %v116_v7 = vld [vmem:[#allocation9 + $0x10] sm:$0xff]  ;;  %s789_s14 = smov [#allocation12]  }
  0x5b   :  { %483 = vmatprep.mubr.msk.f32.mxu0 %vm787_vm0, %v788_v1  ;;  %518 = vmatprep.mubr.msk.f32.mxu1 %vm787_vm0, %v788_v1  ;;  %v557_v5 = vpack.c.bf16 %v115_v3, %v114_v2  ;;  %v98_v6 = vld [vmem:[#allocation8 + $0x8] sm:$0xff]  ;;  %v117_v8 = vld [vmem:[#allocation9 + $0x18] sm:$0xff]  ;;  %v99_v10 = vld [vmem:[#allocation8 + $0x10] sm:$0xff]  ;;  %s387_s15 = sshll.u32 %s789_s14, 4  ;;  %s388_s15 = int_to_ptr.vmem [resolvable:$true] %s387_s15 }
  0x5c   :  { %v581_v9 = vpack.c.bf16 %v98_v6, %v97_v4  ;;  %v100_v11 = vld [vmem:[#allocation8 + $0x18] sm:$0xff]  ;;  %v560_v12 = vpack.c.bf16 %v117_v8, %v116_v7  ;;  %v118_v14 = vld [vmem:[#allocation9 + $0x20] sm:$0xff]  ;;  %v119_v15 = vld [vmem:[#allocation9 + $0x28] sm:$0xff]  ;;  %s749_s17 = scalar_lea.vmem %s388_s15, 128  ;;  %p754_p13 = scmp.lt.s32.totalorder %s388_s15, %s388_s15 }
  0x5d   :  { %558 = vmatpush3.bf16.msra.mxu0 %v557_v5  ;;  %v584_v13 = vpack.c.bf16 %v100_v11, %v99_v10  ;;  %v101_v16 = vld [vmem:[#allocation8 + $0x20] sm:$0xff]  ;;  %v102_v17 = vld [vmem:[#allocation8 + $0x28] sm:$0xff]  ;;  %v563_v18 = vpack.c.bf16 %v119_v15, %v118_v14  ;;  %v120_v20 = vld [vmem:[#allocation9 + $0x30] sm:$0xff]  ;;  %p750_p12 = scmp.ne.s32.totalorder %s388_s15, %s749_s17  ;;  %p755_p0 = scmp.lt.s32.totalorder %s749_s17, %s749_s17 }
  0x5e   :  { %582 = vmatpush3.bf16.msra.mxu1 %v581_v9  ;;  %559 = vmatprep.subr.bf16.mxu0 %v786_v0  ;;  %v587_v19 = vpack.c.bf16 %v102_v17, %v101_v16  ;;  %v121_v21 = vld [vmem:[#allocation9 + $0x38] sm:$0xff]  ;;  %v103_v22 = vld [vmem:[#allocation8 + $0x30] sm:$0xff]  ;;  %v122_v26 = vld [vmem:[#allocation9 + $0x40] sm:$0xff] }
  0x5f   :  { %583 = vmatprep.subr.bf16.mxu1 %v786_v0  ;;  %v104_v23 = vld [vmem:[#allocation8 + $0x38] sm:$0xff]  ;;  %v566_v24 = vpack.c.bf16 %v121_v21, %v120_v20  ;;  %v123_v27 = vld [vmem:[#allocation9 + $0x48] sm:$0xff]  ;;  %v105_v28 = vld [vmem:[#allocation8 + $0x40] sm:$0xff]  ;;  %p756_p1 = por %p755_p0, %p754_p13 }
  0x60   :  { %v590_v25 = vpack.c.bf16 %v104_v23, %v103_v22  ;;  %v106_v29 = vld [vmem:[#allocation8 + $0x48] sm:$0xff]  ;;  %v569_v30 = vpack.c.bf16 %v123_v27, %v122_v26  ;;  %v124_v32 = vld [vmem:[#allocation9 + $0x50] sm:$0xff]  ;;  %v125_v33 = vld [vmem:[#allocation9 + $0x58] sm:$0xff] }
  0x61   :  { %561 = vmatpush3.bf16.msra.mxu0 %v560_v12  ;;  %v593_v31 = vpack.c.bf16 %v106_v29, %v105_v28  ;;  %v107_v34 = vld [vmem:[#allocation8 + $0x50] sm:$0xff]  ;;  %v108_v35 = vld [vmem:[#allocation8 + $0x58] sm:$0xff]  ;;  %v572_v36 = vpack.c.bf16 %v125_v33, %v124_v32  ;;  %v126_v38 = vld [vmem:[#allocation9 + $0x60] sm:$0xff]  ;;  %p757_p2 = pnand %p756_p1, %p750_p12 }
  0x62   :  { %585 = vmatpush3.bf16.msra.mxu1 %v584_v13  ;;  %562 = vmatprep.subr.bf16.mxu0 %v786_v0  ;;  %v596_v37 = vpack.c.bf16 %v108_v35, %v107_v34  ;;  %v127_v39 = vld [vmem:[#allocation9 + $0x68] sm:$0xff]  ;;  %v109_v40 = vld [vmem:[#allocation8 + $0x60] sm:$0xff]  ;;  %v128_v44 = vld [vmem:[#allocation9 + $0x70] sm:$0xff] }
  0x63   :  { %586 = vmatprep.subr.bf16.mxu1 %v786_v0  ;;  %v110_v41 = vld [vmem:[#allocation8 + $0x68] sm:$0xff]  ;;  %v575_v42 = vpack.c.bf16 %v127_v39, %v126_v38  ;;  %v129_v45 = vld [vmem:[#allocation9 + $0x78] sm:$0xff]  ;;  %v111_v46 = vld [vmem:[#allocation8 + $0x70] sm:$0xff] }
  0x64   :  { %v599_v43 = vpack.c.bf16 %v110_v41, %v109_v40  ;;  %v112_v47 = vld [vmem:[#allocation8 + $0x78] sm:$0xff]  ;;  %v578_v48 = vpack.c.bf16 %v129_v45, %v128_v44  ;;  %v280_v50 = vld [vmem:[#allocation11] sm:$0xff]  ;;  %v281_v51 = vld [vmem:[#allocation11 + $0x8] sm:$0xff] }
  0x65   :  { %564 = vmatpush3.bf16.msra.mxu0 %v563_v18  ;;  %v602_v49 = vpack.c.bf16 %v112_v47, %v111_v46  ;;  %v113_v52 = vld [vmem:[#allocation6] sm:$0xff]  ;;  %v605_v53 = vpack.c.bf16 %v281_v51, %v280_v50  ;;  %v96_v54 = vld [vmem:[#allocation3] sm:$0xff]  ;;  %v284_v58 = vld [vmem:[#allocation11 + $0x20] sm:$0xff] }
  0x66   :  { %588 = vmatpush3.bf16.msra.mxu1 %v587_v19  ;;  %565 = vmatprep.subr.bf16.mxu0 %v786_v0  ;;  %v282_v55 = vld [vmem:[#allocation11 + $0x10] sm:$0xff]  ;;  %v283_v56 = vld [vmem:[#allocation11 + $0x18] sm:$0xff]  ;;  %v285_v59 = vld [vmem:[#allocation11 + $0x28] sm:$0xff] }
  0x67   :  { %589 = vmatprep.subr.bf16.mxu1 %v786_v0  ;;  %v608_v57 = vpack.c.bf16 %v283_v56, %v282_v55  ;;  %v611_v60 = vpack.c.bf16 %v285_v59, %v284_v58  ;;  %v286_v61 = vld [vmem:[#allocation11 + $0x30] sm:$0xff]  ;;  %v287_v62 = vld [vmem:[#allocation11 + $0x38] sm:$0xff]  ;;  %v288_v2 = vld [vmem:[#allocation11 + $0x40] sm:$0xff] }
  0x68   :  { %v614_v63 = vpack.c.bf16 %v287_v62, %v286_v61  ;;  %v289_v3 = vld [vmem:[#allocation11 + $0x48] sm:$0xff]  ;;  %v290_v5 = vld [vmem:[#allocation11 + $0x50] sm:$0xff]  ;;  %v291_v6 = vld [vmem:[#allocation11 + $0x58] sm:$0xff] }
  0x69   :  { %567 = vmatpush3.bf16.msra.mxu0 %v566_v24  ;;  %v617_v4 = vpack.c.bf16 %v289_v3, %v288_v2  ;;  %v292_v7 = vld [vmem:[#allocation11 + $0x60] sm:$0xff]  ;;  %v293_v8 = vld [vmem:[#allocation11 + $0x68] sm:$0xff]  ;;  %v294_v10 = vld [vmem:[#allocation11 + $0x70] sm:$0xff] }
  0x6a   :  { %591 = vmatpush3.bf16.msra.mxu1 %v590_v25  ;;  %568 = vmatprep.subr.bf16.mxu0 %v786_v0  ;;  %v623_v9 = vpack.c.bf16 %v293_v8, %v292_v7  ;;  %v295_v11 = vld [vmem:[#allocation11 + $0x78] sm:$0xff]  ;;  %v398_v15 = vld [vmem:[%s951_s4] ss:$0 sm:$0xff] }
  0x6b   :  { %592 = vmatprep.subr.bf16.mxu1 %v786_v0  ;;  %v626_v12 = vpack.c.bf16 %v295_v11, %v294_v10 }
  0x6d   :  { %570 = vmatpush3.bf16.msra.mxu0 %v569_v30 }
  0x6e   :  { %594 = vmatpush3.bf16.msra.mxu1 %v593_v31  ;;  %571 = vmatprep.subr.bf16.mxu0 %v786_v0 }
  0x6f   :  { %595 = vmatprep.subr.bf16.mxu1 %v786_v0 }
  0x71   :  { %573 = vmatpush3.bf16.msra.mxu0 %v572_v36 }
  0x72   :  { %597 = vmatpush3.bf16.msra.mxu1 %v596_v37  ;;  %574 = vmatprep.subr.bf16.mxu0 %v786_v0 }
  0x73   :  { %598 = vmatprep.subr.bf16.mxu1 %v786_v0 }
  0x75   :  { %576 = vmatpush3.bf16.msra.mxu0 %v575_v42 }
  0x76   :  { %600 = vmatpush3.bf16.msra.mxu1 %v599_v43  ;;  %577 = vmatprep.subr.bf16.mxu0 %v786_v0 }
  0x77   :  { %601 = vmatprep.subr.bf16.mxu1 %v786_v0 }
  0x79   :  { %579 = vmatpush3.bf16.msra.mxu0 %v578_v48 }
  0x7a   :  { %603 = vmatpush3.bf16.msra.mxu1 %v602_v49  ;;  %604 = vmatprep.subr.bf16.mxu0 %v786_v0 }
  0x7c   :  { %484 = vmatmul.mubr.f32.vlgmr.msra.gmra.mrb[0].mxu0 %v113_v52 }
  0x7d   :  { %519 = vmatmul.mubr.f32.vlgmr.msra.gmra.mrb[0].mxu1 %v96_v54  ;;  %606 = vmatpush3.bf16.msra.mxu0 %v605_v53 }
  0x7e   :  { %607 = vmatprep.subr.bf16.mxu0 %v786_v0  ;;  %553 = vmatprep.mubr.msk.f32.mxu0 %vm787_vm0, %v788_v1  ;;  %v620_v1 = vpack.c.bf16 %v291_v6, %v290_v5 }
  0x81   :  { %609 = vmatpush3.bf16.msra.mxu0 %v608_v57 }
  0x82   :  { %610 = vmatprep.subr.bf16.mxu0 %v786_v0 }
  0x85   :  { %612 = vmatpush3.bf16.msra.mxu0 %v611_v60 }
  0x86   :  { %613 = vmatprep.subr.bf16.mxu0 %v786_v0 }
  0x89   :  { %615 = vmatpush3.bf16.msra.mxu0 %v614_v63 }
  0x8a   :  { %616 = vmatprep.subr.bf16.mxu0 %v786_v0 }
  0x8d   :  { %618 = vmatpush3.bf16.msra.mxu0 %v617_v4 }
  0x8e   :  { %619 = vmatprep.subr.bf16.mxu0 %v786_v0 }
  0x91   :  { %621 = vmatpush3.bf16.msra.mxu0 %v620_v1 }
  0x92   :  { %622 = vmatprep.subr.bf16.mxu0 %v786_v0 }
  0x95   :  { %624 = vmatpush3.bf16.msra.mxu0 %v623_v9 }
  0x96   :  { %625 = vmatprep.subr.bf16.mxu0 %v786_v0  ;;  %v399_v0 = vld [vmem:[%s953_s6] ss:$0 sm:$0xff] }
  0x99   :  { %627 = vmatpush3.bf16.msra.mxu0 %v626_v12 }
 0x14f   :  { %v196_v13 = vpop.f32.mrb[0].mxu0 }
 0x150   :  { %v266_v14 = vpop.f32.mrb[0].mxu1  ;;  %v485_v16 = vpop.f32.mrb[1].mxu0 }
 0x151   :  { %v267_v17 = vadd.f32 %v266_v14, %v196_v13  ;;  %v520_v18 = vpop.f32.mrb[1].mxu1 }
 0x153   :  { %v277_v19 = vadd.f32 %v398_v15, %v267_v17 }
 0x155   :  { %v278_v20 = vmax.f32 %v277_v19, 0.0 }
 0x157   :  { %554 = vmatmul.mubr.f32.vlgmr.msra.gmra.mrb[2].mxu0 %v278_v20 }
 0x22a   :  { %v362_v21 = vpop.f32.mrb[2].mxu0 }
 0x22b   :  { %v379_v22 = vadd.f32 %v399_v0, %v362_v21  ;;  %v555_v23 = vpop.f32.mrb[3].mxu0 }
 0x22d   :  { %380 = vst [vmem:[#allocation12] sm:$0xff] %v379_v22 }
 0x22e   :  { %760 = shalt.err (!%p757_p2)
}
 0x22f   :  { %s761_s19 = scalar_lea.hbm %s954_s7, 128 }
 0x230   :  { %p762_p3 = scmp.ne.s32.totalorder %s954_s7, %s761_s19  ;;  %p765_p4 = scmp.lt.u32.totalorder %s761_s19, %s954_s7 }
 0x232   :  { %p767_p5 = pnand %p765_p4, %p762_p3 }
 0x234   :  { %770 = shalt.err (!%p767_p5)
}
 0x235   :  { %390 = dma.vmem_to_hbm [thread:$0]  %s388_s15, 128, %s954_s7, [#allocation5]  }
 0x236   :  { %777 = dma.done.wait [#allocation5], 128  }
 0x237   :  { %778 = vsyncadd [#allocation5], 4294967168 }
 0x238   :  { %394 = vsyncpa [#allocation4], 1 }
 0x239   :  { %395 = vsyncpa [#allocation7], 1 }
 0x23a   :  { %396 = vsyncpa [#allocation10], 1 }
 0x23b   :  { %397 = vsyncpa [#allocation5], 1 }

</bundles_post_ra>
